<compile_context>
chip_gen: v5e
topology: v5e:2x2
jax: 0.10.0
libtpu: 0.0.40
codegen_flags: <defaults>
</compile_context>

<pallas_src>
import math
import functools

import jax
import jax.numpy as jnp
from jax.experimental import pallas as pl
from jax.experimental.pallas import tpu as pltpu


# ---------------------------------------------------------------------------
# Multi-head FullAttention kernel (eval mode; dropout on attn weights = identity)
# ---------------------------------------------------------------------------
def _mha_kernel(q_ref, k_ref, v_ref, o_ref, *, num_heads, e_dim, d_dim, scale,
                causal, q_tile):
    # q_ref: (1, tq, H*E)  k_ref: (1, S, H*E)  v_ref: (1, S, H*D)  o_ref: (1, tq, H*D)
    q = q_ref[0] * scale            # fold softmax scale into Q (tq x d_model mul)
    k = k_ref[0]
    v = v_ref[0]

    tq = q.shape[0]
    s_len = k.shape[0]

    if causal:
        row0 = pl.program_id(1) * q_tile
        rows = row0 + jax.lax.broadcasted_iota(jnp.int32, (tq, s_len), 0)
        cols = jax.lax.broadcasted_iota(jnp.int32, (tq, s_len), 1)
        masked = cols > rows        # strictly-upper-triangular positions -> -inf

    outs = []
    for h in range(num_heads):      # static loop; H is small, heads live in lanes
        qh = q[:, h * e_dim:(h + 1) * e_dim]                   # (tq, E)
        kh = k[:, h * e_dim:(h + 1) * e_dim]                   # (S, E)
        vh = v[:, h * d_dim:(h + 1) * d_dim]                   # (S, D)

        # scores = qh @ kh^T (contract E); operands stay in input dtype, f32 acc
        s = jax.lax.dot_general(qh, kh, (((1,), (1,)), ((), ())),
                                preferred_element_type=jnp.float32)
        if causal:
            s = jnp.where(masked, -jnp.inf, s)

        m = jnp.max(s, axis=-1, keepdims=True)
        p = jnp.exp(s - m)
        denom = jnp.sum(p, axis=-1, keepdims=True)
        p = p * pl.reciprocal(denom, approx=True)              # EUP vrcp slot

        # TODO(synk): attention-weight dropout is identity in eval mode.
        outs.append(jnp.dot(p.astype(vh.dtype), vh,
                            preferred_element_type=jnp.float32))

    # single lane-dense store: heads concatenated along lanes -> (tq, H*D)
    o_ref[0] = jnp.concatenate(outs, axis=-1).astype(o_ref.dtype)


def multi_head_attention(q, k, v, *, num_heads, causal=False, scale=None):
    """q/k: (B, L, H*E) / (B, S, H*E); v: (B, S, H*D).  Returns (B, L, H*D)."""
    B, L, dm_qk = q.shape
    _, S, dm_v = v.shape
    assert dm_qk % num_heads == 0 and dm_v % num_heads == 0
    e_dim = dm_qk // num_heads
    d_dim = dm_v // num_heads
    sc = (1.0 / math.sqrt(e_dim)) if scale is None else scale

    tq = L if L <= 256 else 256          # q-tile; multiple of 8 when tiled
    n_qt = pl.cdiv(L, tq)

    kernel = functools.partial(_mha_kernel, num_heads=num_heads, e_dim=e_dim,
                               d_dim=d_dim, scale=sc, causal=causal, q_tile=tq)

    itemsize = q.dtype.itemsize
    cost = pl.CostEstimate(
        flops=int(2 * B * num_heads * L * S * (e_dim + d_dim)),
        transcendentals=int(B * num_heads * L * S),
        bytes_accessed=int((q.size + k.size + v.size + B * L * dm_v) * itemsize),
    )

    return pl.pallas_call(
        kernel,
        out_shape=jax.ShapeDtypeStruct((B, L, dm_v), q.dtype),
        grid_spec=pltpu.PrefetchScalarGridSpec(
            num_scalar_prefetch=0,
            grid=(B, n_qt),
            in_specs=[
                pl.BlockSpec((1, tq, dm_qk), lambda b, i: (b, i, 0)),
                pl.BlockSpec((1, S, dm_qk), lambda b, i: (b, 0, 0)),
                pl.BlockSpec((1, S, dm_v), lambda b, i: (b, 0, 0)),
            ],
            out_specs=pl.BlockSpec((1, tq, dm_v), lambda b, i: (b, i, 0)),
        ),
        compiler_params=pltpu.CompilerParams(
            dimension_semantics=("parallel", "parallel")),
        cost_estimate=cost,
    )(q, k, v)


def full_attention(queries, keys, values, *, mask_flag=True, scale=None):
    """iTransformer FullAttention.forward (eval).  queries: (B,L,H,E), keys:
    (B,S,H,E), values: (B,S,H,D) -> (B,L,H,D).  Only adjacent-dim reshapes
    (no transposes / HBM round trips)."""
    B, L, H, E = queries.shape
    _, S, _, D = values.shape
    out = multi_head_attention(
        queries.reshape(B, L, H * E), keys.reshape(B, S, H * E),
        values.reshape(B, S, H * D), num_heads=H, causal=mask_flag, scale=scale)
    return out.reshape(B, L, H, D)


# ---------------------------------------------------------------------------
# Fused residual + LayerNorm1 + FFN (Conv1d k=1) + residual + LayerNorm2 kernel
# ---------------------------------------------------------------------------
def _ffn_ln_kernel(x_ref, a_ref, w1_ref, b1_ref, w2_ref, b2_ref,
                   g1_ref, be1_ref, g2_ref, be2_ref, o_ref, *, activation, eps):
    # x + dropout(new_x); dropout is identity in eval mode
    x = x_ref[...].astype(jnp.float32) + a_ref[...].astype(jnp.float32)

    mu1 = jnp.mean(x, axis=-1, keepdims=True)
    xc = x - mu1
    var1 = jnp.mean(xc * xc, axis=-1, keepdims=True)
    x1 = xc * jax.lax.rsqrt(var1 + eps)
    x1 = x1 * g1_ref[...].astype(jnp.float32) + be1_ref[...].astype(jnp.float32)

    h = jnp.dot(x1.astype(w1_ref.dtype), w1_ref[...],
                preferred_element_type=jnp.float32) + b1_ref[...].astype(jnp.float32)
    if activation == "relu":
        h = jnp.maximum(h, 0.0)
    else:
        # TODO(synk): torch F.gelu is erf-based; tanh approximation used here.
        h = jax.nn.gelu(h, approximate=True)
    y = jnp.dot(h.astype(w2_ref.dtype), w2_ref[...],
                preferred_element_type=jnp.float32) + b2_ref[...].astype(jnp.float32)

    z = x1 + y
    mu2 = jnp.mean(z, axis=-1, keepdims=True)
    zc = z - mu2
    var2 = jnp.mean(zc * zc, axis=-1, keepdims=True)
    z2 = zc * jax.lax.rsqrt(var2 + eps)
    o_ref[...] = (z2 * g2_ref[...].astype(jnp.float32)
                  + be2_ref[...].astype(jnp.float32)).astype(o_ref.dtype)


def ffn_layernorm_block(x, new_x, params, *, activation="relu", eps=1e-5):
    B, N, dm = x.shape
    d_ff = params["w1"].shape[1]
    T = B * N
    tm = T if T <= 512 else 256
    n_t = pl.cdiv(T, tm)

    row = lambda a: a.reshape(1, -1)
    kernel = functools.partial(_ffn_ln_kernel, activation=activation, eps=eps)

    out = pl.pallas_call(
        kernel,
        out_shape=jax.ShapeDtypeStruct((T, dm), x.dtype),
        grid_spec=pltpu.PrefetchScalarGridSpec(
            num_scalar_prefetch=0,
            grid=(n_t,),
            in_specs=[
                pl.BlockSpec((tm, dm), lambda i: (i, 0)),      # x
                pl.BlockSpec((tm, dm), lambda i: (i, 0)),      # new_x (attention out)
                pl.BlockSpec((dm, d_ff), lambda i: (0, 0)),    # conv1 weight
                pl.BlockSpec((1, d_ff), lambda i: (0, 0)),     # conv1 bias
                pl.BlockSpec((d_ff, dm), lambda i: (0, 0)),    # conv2 weight
                pl.BlockSpec((1, dm), lambda i: (0, 0)),       # conv2 bias
                pl.BlockSpec((1, dm), lambda i: (0, 0)),       # norm1 gamma
                pl.BlockSpec((1, dm), lambda i: (0, 0)),       # norm1 beta
                pl.BlockSpec((1, dm), lambda i: (0, 0)),       # norm2 gamma
                pl.BlockSpec((1, dm), lambda i: (0, 0)),       # norm2 beta
            ],
            out_specs=pl.BlockSpec((tm, dm), lambda i: (i, 0)),
        ),
        compiler_params=pltpu.CompilerParams(dimension_semantics=("parallel",)),
    )(x.reshape(T, dm), new_x.reshape(T, dm),
      params["w1"], row(params["b1"]), params["w2"], row(params["b2"]),
      row(params["ln1_w"]), row(params["ln1_b"]),
      row(params["ln2_w"]), row(params["ln2_b"]))
    return out.reshape(B, N, dm)


# ---------------------------------------------------------------------------
# Full EncoderLayer forward (attention = AttentionLayer(FullAttention), as in
# iTransformer; attn weights not returned — output_attention=False path)
# ---------------------------------------------------------------------------
def encoder_layer_forward(x, params, *, n_heads, activation="relu", mask_flag=False):
    q = x @ params["wq"] + params["bq"]          # projections stay lane-dense
    k = x @ params["wk"] + params["bk"]
    v = x @ params["wv"] + params["bv"]
    ctx = multi_head_attention(q, k, v, num_heads=n_heads, causal=mask_flag)
    new_x = ctx @ params["wo"] + params["bo"]
    return ffn_layernorm_block(x, new_x, params, activation=activation)


# ---------------------------------------------------------------------------
# Pure-JAX references
# ---------------------------------------------------------------------------
def _layernorm_ref(x, g, b, eps=1e-5):
    mu = jnp.mean(x, axis=-1, keepdims=True)
    var = jnp.mean((x - mu) ** 2, axis=-1, keepdims=True)
    return (x - mu) / jnp.sqrt(var + eps) * g + b


def _full_attention_ref(queries, keys, values, *, mask_flag, scale=None):
    B, L, H, E = queries.shape
    _, S, _, D = values.shape
    sc = scale if scale is not None else 1.0 / math.sqrt(E)
    scores = jnp.einsum("blhe,bshe->bhls", queries, keys)
    if mask_flag:
        mask = jnp.triu(jnp.ones((L, S), dtype=bool), k=1)
        scores = jnp.where(mask[None, None], -jnp.inf, scores)
    A = jax.nn.softmax(sc * scores, axis=-1)
    return jnp.einsum("bhls,bshd->blhd", A, values)


def _encoder_layer_ref(x, params, *, n_heads, activation="relu", mask_flag=False):
    B, N, dm = x.shape
    E = dm // n_heads
    q = (x @ params["wq"] + params["bq"]).reshape(B, N, n_heads, E)
    k = (x @ params["wk"] + params["bk"]).reshape(B, N, n_heads, E)
    v = (x @ params["wv"] + params["bv"]).reshape(B, N, n_heads, E)
    ctx = _full_attention_ref(q, k, v, mask_flag=mask_flag).reshape(B, N, dm)
    new_x = ctx @ params["wo"] + params["bo"]
    x1 = _layernorm_ref(x + new_x, params["ln1_w"], params["ln1_b"])
    act = (lambda t: jnp.maximum(t, 0.0)) if activation == "relu" else jax.nn.gelu
    y = act(x1 @ params["w1"] + params["b1"]) @ params["w2"] + params["b2"]
    return _layernorm_ref(x1 + y, params["ln2_w"], params["ln2_b"])


if __name__ == "__main__":
    B, N, n_heads, d_model = 2, 8, 4, 128     # N variates; head dim = 32
    d_ff = 4 * d_model

    root = jax.random.PRNGKey(0)
    ks = jax.random.split(root, 20)

    def w(k, fan_in, shape):
        return jax.random.normal(k, shape, jnp.float32) / math.sqrt(fan_in)

    params = {
        "wq": w(ks[0], d_model, (d_model, d_model)),
        "bq": 0.02 * jax.random.normal(ks[1], (d_model,), jnp.float32),
        "wk": w(ks[2], d_model, (d_model, d_model)),
        "bk": 0.02 * jax.random.normal(ks[3], (d_model,), jnp.float32),
        "wv": w(ks[4], d_model, (d_model, d_model)),
        "bv": 0.02 * jax.random.normal(ks[5], (d_model,), jnp.float32),
        "wo": w(ks[6], d_model, (d_model, d_model)),
        "bo": 0.02 * jax.random.normal(ks[7], (d_model,), jnp.float32),
        "w1": w(ks[8], d_model, (d_model, d_ff)),
        "b1": 0.02 * jax.random.normal(ks[9], (d_ff,), jnp.float32),
        "w2": w(ks[10], d_ff, (d_ff, d_model)),
        "b2": 0.02 * jax.random.normal(ks[11], (d_model,), jnp.float32),
        "ln1_w": 1.0 + 0.05 * jax.random.normal(ks[12], (d_model,), jnp.float32),
        "ln1_b": 0.05 * jax.random.normal(ks[13], (d_model,), jnp.float32),
        "ln2_w": 1.0 + 0.05 * jax.random.normal(ks[14], (d_model,), jnp.float32),
        "ln2_b": 0.05 * jax.random.normal(ks[15], (d_model,), jnp.float32),
    }

    x = jax.random.normal(ks[16], (B, N, d_model), jnp.float32)

    # Full EncoderLayer forward (iTransformer encoder uses non-causal attention).
    out = jax.block_until_ready(
        encoder_layer_forward(x, params, n_heads=n_heads, activation="relu"))
    ref = _encoder_layer_ref(x, params, n_heads=n_heads, activation="relu")
    assert out.shape == (B, N, d_model)
    assert jnp.allclose(out, ref, atol=2e-2, rtol=2e-2), "encoder layer mismatch"

    # Standalone causal FullAttention path (mask_flag=True), native (B,L,H,E) layout.
    E = d_model // n_heads
    kq, kk, kv = jax.random.split(ks[17], 3)
    queries = jax.random.normal(kq, (B, N, n_heads, E), jnp.float32)
    keys_ = jax.random.normal(kk, (B, N, n_heads, E), jnp.float32)
    values = jax.random.normal(kv, (B, N, n_heads, E), jnp.float32)
    V = jax.block_until_ready(full_attention(queries, keys_, values, mask_flag=True))
    Vr = _full_attention_ref(queries, keys_, values, mask_flag=True)
    assert V.shape == (B, N, n_heads, E)
    assert jnp.allclose(V, Vr, atol=2e-2, rtol=2e-2), "attention mismatch"

    print("KERNEL_OK")
</pallas_src>

<mosaic_0001>
module attributes {stable_mosaic.version = 11 : i64} {
  func.func @_mha_kernel(%arg0: i32, %arg1: i32, %arg2: memref<1x8x128xf32, #tpu.memory_space<vmem>>, %arg3: memref<1x8x128xf32, #tpu.memory_space<vmem>>, %arg4: memref<1x8x128xf32, #tpu.memory_space<vmem>>, %arg5: memref<1x8x128xf32, #tpu.memory_space<vmem>>) attributes {dimension_semantics = [#tpu.dimension_semantics<parallel>, #tpu.dimension_semantics<parallel>], iteration_bounds = array<i64: 2, 1>, scalar_prefetch = 0 : i64, scratch_operands = 0 : i64, tpu.core_type = #tpu.core_type<tc>, window_params = [{transform_indices = @transform_0, window_bounds = array<i64: 1, 8, 128>}, {transform_indices = @transform_1, window_bounds = array<i64: 1, 8, 128>}, {transform_indices = @transform_2, window_bounds = array<i64: 1, 8, 128>}, {transform_indices = @transform_3, window_bounds = array<i64: 1, 8, 128>}]} {
    %c0 = arith.constant 0 : index
    %c0_0 = arith.constant 0 : index
    %c0_1 = arith.constant 0 : index
    %0 = vector.load %arg2[%c0, %c0_0, %c0_1] : memref<1x8x128xf32, #tpu.memory_space<vmem>>, vector<1x8x128xf32>
    %1 = vector.shape_cast %0 : vector<1x8x128xf32> to vector<8x128xf32>
    %cst = arith.constant 0.176776692 : f32
    %2 = vector.broadcast %cst : f32 to vector<8x128xf32>
    %3 = arith.mulf %1, %2 : vector<8x128xf32>
    %c0_2 = arith.constant 0 : index
    %c0_3 = arith.constant 0 : index
    %c0_4 = arith.constant 0 : index
    %4 = vector.load %arg3[%c0_2, %c0_3, %c0_4] : memref<1x8x128xf32, #tpu.memory_space<vmem>>, vector<1x8x128xf32>
    %5 = vector.shape_cast %4 : vector<1x8x128xf32> to vector<8x128xf32>
    %c0_5 = arith.constant 0 : index
    %c0_6 = arith.constant 0 : index
    %c0_7 = arith.constant 0 : index
    %6 = vector.load %arg4[%c0_5, %c0_6, %c0_7] : memref<1x8x128xf32, #tpu.memory_space<vmem>>, vector<1x8x128xf32>
    %7 = vector.shape_cast %6 : vector<1x8x128xf32> to vector<8x128xf32>
    %8 = vector.extract_strided_slice %3 {offsets = [0, 0], sizes = [8, 32], strides = [1, 1]} : vector<8x128xf32> to vector<8x32xf32>
    %9 = vector.extract_strided_slice %5 {offsets = [0, 0], sizes = [8, 32], strides = [1, 1]} : vector<8x128xf32> to vector<8x32xf32>
    %10 = vector.extract_strided_slice %7 {offsets = [0, 0], sizes = [8, 32], strides = [1, 1]} : vector<8x128xf32> to vector<8x32xf32>
    %cst_8 = arith.constant dense<0.000000e+00> : vector<8x8xf32>
    %11 = tpu.matmul %8, %9, %cst_8 {dimension_numbers = #tpu.dot_dimension_numbers<[1], [1], [0], [0], [0, 0, 1, 0], [], []>} : vector<8x32xf32>, vector<8x32xf32>, vector<8x8xf32> -> vector<8x8xf32>
    %cst_9 = arith.constant dense<0xFF800000> : vector<8xf32>
    %12 = vector.multi_reduction <maximumf>, %11, %cst_9 [1] : vector<8x8xf32> to vector<8xf32>
    %13 = vector.shape_cast %12 : vector<8xf32> to vector<8x1xf32>
    %14 = vector.broadcast %13 : vector<8x1xf32> to vector<8x8xf32>
    %15 = arith.subf %11, %14 : vector<8x8xf32>
    %16 = math.exp %15 : vector<8x8xf32>
    %cst_10 = arith.constant dense<0.000000e+00> : vector<8xf32>
    %17 = vector.multi_reduction <add>, %16, %cst_10 [1] : vector<8x8xf32> to vector<8xf32>
    %18 = vector.shape_cast %17 : vector<8xf32> to vector<8x1xf32>
    %19 = tpu.reciprocal %18 {approx = true} : vector<8x1xf32> -> vector<8x1xf32>
    %20 = vector.broadcast %19 : vector<8x1xf32> to vector<8x8xf32>
    %21 = arith.mulf %16, %20 : vector<8x8xf32>
    %cst_11 = arith.constant dense<0.000000e+00> : vector<8x32xf32>
    %22 = tpu.matmul %21, %10, %cst_11 {dimension_numbers = #tpu.dot_dimension_numbers<[1], [0], [0], [1], [0, 0, 1, 1], [], []>} : vector<8x8xf32>, vector<8x32xf32>, vector<8x32xf32> -> vector<8x32xf32>
    %23 = vector.extract_strided_slice %3 {offsets = [0, 32], sizes = [8, 32], strides = [1, 1]} : vector<8x128xf32> to vector<8x32xf32>
    %24 = vector.extract_strided_slice %5 {offsets = [0, 32], sizes = [8, 32], strides = [1, 1]} : vector<8x128xf32> to vector<8x32xf32>
    %25 = vector.extract_strided_slice %7 {offsets = [0, 32], sizes = [8, 32], strides = [1, 1]} : vector<8x128xf32> to vector<8x32xf32>
    %cst_12 = arith.constant dense<0.000000e+00> : vector<8x8xf32>
    %26 = tpu.matmul %23, %24, %cst_12 {dimension_numbers = #tpu.dot_dimension_numbers<[1], [1], [0], [0], [0, 0, 1, 0], [], []>} : vector<8x32xf32>, vector<8x32xf32>, vector<8x8xf32> -> vector<8x8xf32>
    %cst_13 = arith.constant dense<0xFF800000> : vector<8xf32>
    %27 = vector.multi_reduction <maximumf>, %26, %cst_13 [1] : vector<8x8xf32> to vector<8xf32>
    %28 = vector.shape_cast %27 : vector<8xf32> to vector<8x1xf32>
    %29 = vector.broadcast %28 : vector<8x1xf32> to vector<8x8xf32>
    %30 = arith.subf %26, %29 : vector<8x8xf32>
    %31 = math.exp %30 : vector<8x8xf32>
    %cst_14 = arith.constant dense<0.000000e+00> : vector<8xf32>
    %32 = vector.multi_reduction <add>, %31, %cst_14 [1] : vector<8x8xf32> to vector<8xf32>
    %33 = vector.shape_cast %32 : vector<8xf32> to vector<8x1xf32>
    %34 = tpu.reciprocal %33 {approx = true} : vector<8x1xf32> -> vector<8x1xf32>
    %35 = vector.broadcast %34 : vector<8x1xf32> to vector<8x8xf32>
    %36 = arith.mulf %31, %35 : vector<8x8xf32>
    %cst_15 = arith.constant dense<0.000000e+00> : vector<8x32xf32>
    %37 = tpu.matmul %36, %25, %cst_15 {dimension_numbers = #tpu.dot_dimension_numbers<[1], [0], [0], [1], [0, 0, 1, 1], [], []>} : vector<8x8xf32>, vector<8x32xf32>, vector<8x32xf32> -> vector<8x32xf32>
    %38 = vector.extract_strided_slice %3 {offsets = [0, 64], sizes = [8, 32], strides = [1, 1]} : vector<8x128xf32> to vector<8x32xf32>
    %39 = vector.extract_strided_slice %5 {offsets = [0, 64], sizes = [8, 32], strides = [1, 1]} : vector<8x128xf32> to vector<8x32xf32>
    %40 = vector.extract_strided_slice %7 {offsets = [0, 64], sizes = [8, 32], strides = [1, 1]} : vector<8x128xf32> to vector<8x32xf32>
    %cst_16 = arith.constant dense<0.000000e+00> : vector<8x8xf32>
    %41 = tpu.matmul %38, %39, %cst_16 {dimension_numbers = #tpu.dot_dimension_numbers<[1], [1], [0], [0], [0, 0, 1, 0], [], []>} : vector<8x32xf32>, vector<8x32xf32>, vector<8x8xf32> -> vector<8x8xf32>
    %cst_17 = arith.constant dense<0xFF800000> : vector<8xf32>
    %42 = vector.multi_reduction <maximumf>, %41, %cst_17 [1] : vector<8x8xf32> to vector<8xf32>
    %43 = vector.shape_cast %42 : vector<8xf32> to vector<8x1xf32>
    %44 = vector.broadcast %43 : vector<8x1xf32> to vector<8x8xf32>
    %45 = arith.subf %41, %44 : vector<8x8xf32>
    %46 = math.exp %45 : vector<8x8xf32>
    %cst_18 = arith.constant dense<0.000000e+00> : vector<8xf32>
    %47 = vector.multi_reduction <add>, %46, %cst_18 [1] : vector<8x8xf32> to vector<8xf32>
    %48 = vector.shape_cast %47 : vector<8xf32> to vector<8x1xf32>
    %49 = tpu.reciprocal %48 {approx = true} : vector<8x1xf32> -> vector<8x1xf32>
    %50 = vector.broadcast %49 : vector<8x1xf32> to vector<8x8xf32>
    %51 = arith.mulf %46, %50 : vector<8x8xf32>
    %cst_19 = arith.constant dense<0.000000e+00> : vector<8x32xf32>
    %52 = tpu.matmul %51, %40, %cst_19 {dimension_numbers = #tpu.dot_dimension_numbers<[1], [0], [0], [1], [0, 0, 1, 1], [], []>} : vector<8x8xf32>, vector<8x32xf32>, vector<8x32xf32> -> vector<8x32xf32>
    %53 = vector.extract_strided_slice %3 {offsets = [0, 96], sizes = [8, 32], strides = [1, 1]} : vector<8x128xf32> to vector<8x32xf32>
    %54 = vector.extract_strided_slice %5 {offsets = [0, 96], sizes = [8, 32], strides = [1, 1]} : vector<8x128xf32> to vector<8x32xf32>
    %55 = vector.extract_strided_slice %7 {offsets = [0, 96], sizes = [8, 32], strides = [1, 1]} : vector<8x128xf32> to vector<8x32xf32>
    %cst_20 = arith.constant dense<0.000000e+00> : vector<8x8xf32>
    %56 = tpu.matmul %53, %54, %cst_20 {dimension_numbers = #tpu.dot_dimension_numbers<[1], [1], [0], [0], [0, 0, 1, 0], [], []>} : vector<8x32xf32>, vector<8x32xf32>, vector<8x8xf32> -> vector<8x8xf32>
    %cst_21 = arith.constant dense<0xFF800000> : vector<8xf32>
    %57 = vector.multi_reduction <maximumf>, %56, %cst_21 [1] : vector<8x8xf32> to vector<8xf32>
    %58 = vector.shape_cast %57 : vector<8xf32> to vector<8x1xf32>
    %59 = vector.broadcast %58 : vector<8x1xf32> to vector<8x8xf32>
    %60 = arith.subf %56, %59 : vector<8x8xf32>
    %61 = math.exp %60 : vector<8x8xf32>
    %cst_22 = arith.constant dense<0.000000e+00> : vector<8xf32>
    %62 = vector.multi_reduction <add>, %61, %cst_22 [1] : vector<8x8xf32> to vector<8xf32>
    %63 = vector.shape_cast %62 : vector<8xf32> to vector<8x1xf32>
    %64 = tpu.reciprocal %63 {approx = true} : vector<8x1xf32> -> vector<8x1xf32>
    %65 = vector.broadcast %64 : vector<8x1xf32> to vector<8x8xf32>
    %66 = arith.mulf %61, %65 : vector<8x8xf32>
    %cst_23 = arith.constant dense<0.000000e+00> : vector<8x32xf32>
    %67 = tpu.matmul %66, %55, %cst_23 {dimension_numbers = #tpu.dot_dimension_numbers<[1], [0], [0], [1], [0, 0, 1, 1], [], []>} : vector<8x8xf32>, vector<8x32xf32>, vector<8x32xf32> -> vector<8x32xf32>
    %68 = tpu.concatenate %22, %37, %52, %67 in 1 : vector<8x32xf32>, vector<8x32xf32>, vector<8x32xf32>, vector<8x32xf32> -> vector<8x128xf32>
    %c0_24 = arith.constant 0 : index
    %c0_25 = arith.constant 0 : index
    %c0_26 = arith.constant 0 : index
    %69 = vector.load %arg5[%c0_24, %c0_25, %c0_26] : memref<1x8x128xf32, #tpu.memory_space<vmem>>, vector<1x8x128xf32>
    %70 = vector.shape_cast %69 : vector<1x8x128xf32> to vector<8x128xf32>
    %71 = vector.shape_cast %68 : vector<8x128xf32> to vector<1x8x128xf32>
    tpu.vector_store %arg5[%c0_24, %c0_25, %c0_26], %71 {strides = array<i32>} : memref<1x8x128xf32, #tpu.memory_space<vmem>>, vector<1x8x128xf32>,
    return
  }
  func.func @transform_0(%arg0: i32, %arg1: i32) -> (i32, i32, i32) {
    %c0_i32 = arith.constant 0 : i32
    %c0_i32_0 = arith.constant 0 : i32
    return %arg0, %arg1, %c0_i32 : i32, i32, i32
  }
  func.func @transform_1(%arg0: i32, %arg1: i32) -> (i32, i32, i32) {
    %c0_i32 = arith.constant 0 : i32
    %c0_i32_0 = arith.constant 0 : i32
    %c0_i32_1 = arith.constant 0 : i32
    return %arg0, %c0_i32, %c0_i32_0 : i32, i32, i32
  }
  func.func @transform_2(%arg0: i32, %arg1: i32) -> (i32, i32, i32) {
    %c0_i32 = arith.constant 0 : i32
    %c0_i32_0 = arith.constant 0 : i32
    %c0_i32_1 = arith.constant 0 : i32
    return %arg0, %c0_i32, %c0_i32_0 : i32, i32, i32
  }
  func.func @transform_3(%arg0: i32, %arg1: i32) -> (i32, i32, i32) {
    %c0_i32 = arith.constant 0 : i32
    %c0_i32_0 = arith.constant 0 : i32
    return %arg0, %arg1, %c0_i32 : i32, i32, i32
  }
}

</mosaic_0001>

<bundles_post_ra>
// kernel: tpu_custom_call.1
= control target key start
LH: loop header
LB: loop body
LE: loop exit
PB: predicated region body
PF: predicated region fallthrough
CT: control target
= control target key end

     0   :  { %s1214_s0 = inlined_call_operand.hbm [shape: f32[2,8,128], index: 0, kind: input, shape index: {}]   ;;  %s1215_s1 = inlined_call_operand.hbm [shape: f32[2,8,128], index: 1, kind: input, shape index: {}]   ;;  %s1216_s2 = inlined_call_operand.hbm [shape: f32[2,8,128], index: 2, kind: input, shape index: {}]   ;;  %s1217_s3 = inlined_call_operand.hbm [shape: f32[2,8,128], index: 3, kind: output, shape index: {}]  }
   0x1   :  { %1220 = sst [smem:[#allocation15_spill]] %s1215_s1 }
   0x2   :  { %8 = vsyncpa [#allocation3], 0 }
   0x3   :  { %10 = vsyncpa [#allocation3 + $0x1], 0 }
   0x4   :  { %11 = vsyncpa [#allocation6], 0 }
   0x5   :  { %13 = vsyncpa [#allocation6 + $0x1], 0 }
   0x6   :  { %14 = vsyncpa [#allocation4], 0 }
   0x7   :  { %16 = vsyncpa [#allocation4 + $0x1], 0  ;;  %s1023_s12 = smov 0   ;;  %s1025_s13 = smov 0  }
   0x8   :  { %s1027_s14 = smov 0   ;;  %s1029_s15 = smov 0  }
   0x9   :  { %s1031_s16 = smov 0   ;;  %s1033_s17 = smov 0  }
   0xa LB: > { %1221 = sst [smem:[#allocation12_spill]] %s994_s16  ;;  %s1054_s18 = sadd.s32 4294967295, %s998_s17   ;;  %s998_s17 = sphi %s1033_s17, %s22_s17   ;;  %s994_s16 = sphi %s1031_s16, %s1233_s16   ;;  %s990_s15 = sphi %s1029_s15, %s1232_s15   ;;  %s986_s14 = sphi %s1027_s14, %s1236_s14   ;;  %s982_s13 = sphi %s1025_s13, %s1235_s13   ;;  %s978_s12 = sphi %s1023_s12, %s1234_s12  }
   0xb   : > { %s701_s19 = sadd.s32 4294967294, %s998_s17   ;;  %s34_s20 = sadd.s32 1, %s994_s16 }
   0xc   : > { %s43_s21 = sadd.s32 1, %s986_s14  ;;  %p36_p0 = scmp.ge.s32.totalorder %s34_s20, 2 }
   0xd   : > { %p50_p1 = scmp.ne.s32.totalorder %s986_s14, %s982_s13  ;;  %p51_p2 = scmp.eq.s32.totalorder %s998_s17, 0 }
   0xe   : > { %p56_p3 = scmp.ne.s32.totalorder %s982_s13, %s978_s12  ;;  %s1238_s20 = smov (%p36_p0, %s34_s20), 0 }
   0xf   : > { %1222 = sst [smem:[#allocation13_spill]] %s1238_s20  ;;  %p1066_p4 = por %p51_p2, %p50_p1 }
  0x10   : > { %p57_p5 = scmp.eq.s32.totalorder %s1054_s18, 0  ;;  %s38_s23 = ssub.s32 %s994_s16, %s1238_s20 }
  0x11   : > { %p134_p6 = scmp.eq.s32.totalorder %s1054_s18, 1  ;;  %p41_p7 = scmp.eq.s32.totalorder %s38_s23, 0 }
  0x12   : > { %p1074_p8 = por %p57_p5, %p56_p3  ;;  %p140_p10 = scmp.eq.s32.totalorder %s701_s19, 1 }
  0x13   : > { %p1078_p9 = por %p134_p6, %p50_p1  ;;  %p703_p12 = scmp.ge.s32.totalorder %s998_s17, 2 }
  0x14   : > { %s1083_s26 = scalar_select %p41_p7, %s986_s14, %s43_s21  }
  0x15   : > { %p1085_p11 = por %p140_p10, %p56_p3  ;;  %p753_p13 = scmp.lt.s32.totalorder %s998_s17, 2 }
  0x16   : > { %1226 = sst [smem:[#allocation14_spill]] %s1083_s26  ;;  %s160_s28 = sand.u32 1, %s986_s14  }
  0x17   : > { %s704_s29 = sshll.u32 %s160_s28, 3  ;;  %s705_s30 = sshll.u32 %s994_s16, 3 }
  0x18   : > { %p1095_p0 = pnand %p753_p13, %p1066_p4  ;;  %s180_s5 = sand.u32 1, %s998_s17  }
  0x19   : > { %s1229_s1 = sld [smem:[#allocation15_spill]]  ;;  %s184_s10 = scalar_lea.vmem [#allocation5], %s704_s29 }
  0x1a   : > { %s192_s11 = sshll.u32 %s184_s10, 4  ;;  %s181_s19 = scalar_lea.sflag [#allocation6], %s180_s5  ;;  %s193_s11 = int_to_ptr.vmem [resolvable:$true] %s192_s11 }
  0x1b   : > { %p710_p1 = scmp.ge.s32.totalorder %s998_s17, 1  ;;  %p216_p2 = scmp.lt.s32.totalorder %s998_s17, 3 }
  0x1c   : > { %s169_s6 = scalar_lea.hbm %s1214_s0, %s705_s30  ;;  %s161_s10 = scalar_lea.sflag [#allocation3], %s160_s28 }
  0x1d   : > { %p1107_p3 = pnand %p710_p1, %p216_p2  ;;  %s171_s7 = sshll.u32 %s169_s6, 4  ;;  %s172_s7 = int_to_ptr.hbm [resolvable:$true] %s171_s7 }
  0x1e   : > { %s203_s16 = scalar_lea.vmem [#allocation7], %s704_s29  ;;  %s1124_s22 = sand.u32 (!%p1107_p3), 1, %s982_s13  }
  0x1f   : > { %s188_s8 = scalar_lea.hbm %s1229_s1, %s705_s30  ;;  %s211_s26 = sshll.u32 %s203_s16, 4  ;;  %s212_s26 = int_to_ptr.vmem [resolvable:$true] %s211_s26 }
  0x20   : > { %s190_s9 = sshll.u32 %s188_s8, 4  ;;  %s164_s8 = scalar_lea.vmem [#allocation2], %s704_s29  ;;  %s191_s9 = int_to_ptr.hbm [resolvable:$true] %s190_s9 }
  0x21   : > { %745 = dma.hbm_to_vmem [thread:$0]  (!%p1095_p0), %s191_s9, 128, %s193_s11, %s181_s19  }
  0x22   : > { %s173_s1 = sshll.u32 %s164_s8, 4  ;;  %s207_s11 = scalar_lea.hbm %s1216_s2, %s705_s30  ;;  %s174_s1 = int_to_ptr.vmem [resolvable:$true] %s173_s1 }
  0x23   : > { %742 = dma.hbm_to_vmem [thread:$0]  (!%p1095_p0), %s172_s7, 128, %s174_s1, %s161_s10  }
  0x24   : > { %s209_s20 = sshll.u32 %s207_s11, 4  ;;  %220 = sbr.rel (%p1107_p3) target bundleno = 1071 (0x42f), region = 32  ;;  %s210_s20 = int_to_ptr.hbm [resolvable:$true] %s209_s20 }
  0x25   : > { %748 = dma.hbm_to_vmem [thread:$0]  (!%p1095_p0), %s210_s20, 128, %s212_s26, %s181_s19  }
  0x26   : > { %s1127_s1 = sshll.u32 (!%p1107_p3), %s1124_s22, 3  ;;  %s223_s28 = scalar_lea.sflag (!%p1107_p3), [#allocation3], %s1124_s22 }
  0x27   : > { %s226_s30 = scalar_lea.vmem (!%p1107_p3), [#allocation2], %s1127_s1 }
  0x29   : > { %965 = dma.done.wait (%p1074_p8), %s223_s28, 128  }
  0x2a   : > { %967 = vsyncadd (%p1074_p8), %s223_s28, 4294967168  ;;  %s232_s16 = sand.u32 1, %s1054_s18   ;;  %s236_s26 = scalar_lea.vmem [#allocation5], %s1127_s1 }
  0x2b   : > { %s233_s20 = scalar_lea.sflag [#allocation6], %s232_s16 }
  0x2c   : > { %969 = dma.done.wait (%p1074_p8), %s233_s20, 256  }
  0x2d   : > { %971 = vsyncadd (%p1074_p8), %s233_s20, 4294967040  ;;  %vm284_vm0 = vcmask 261120   ;;  %v282_v0 = vld [vmem:[%s236_s26] sm:$0xff]  ;;  %v280_v1 = vld [vmem:[%s226_s30] sm:$0xff]  ;;  %s1000_s29 = smov 96   ;;  %s1001_s4 = smov 64  }
  0x2e   : > { %715 = vmatpush.xpose.msk.msra.mxu0 %vm284_vm0, %v282_v0  ;;  %v281_v2 = vmul.f32 0.17677669, %v280_v1  ;;  %348 = vrot.lane.b32.xlu1 %v282_v0, %s1000_s29  ;;  %s1002_s18 = smov 32   ;;  %vm311_vm1 = vcmask 64512   ;;  %s246_s24 = scalar_lea.vmem [#allocation7], %s1127_s1  ;;  %vm555_vm2 = vcmask 523264  }
  0x2f   : > { %414 = vrot.lane.b32.xlu2 %v282_v0, %s1001_s4  ;;  %v283_v17 = vld [vmem:[%s246_s24] sm:$0xff]  ;;  %s728_s19 = sshll.u32 %s990_s15, 3  ;;  %s279_s7 = scalar_lea.vmem [#allocation8], %s1127_s1  ;;  %vm557_vm3 = vcmask 785408  }
  0x30   : > { %341 = vmatpush.msra.mxu1 %v283_v17  ;;  %s572_s6 = scalar_lea.hbm %s1217_s3, %s728_s19  ;;  %s574_s8 = sshll.u32 %s279_s7, 4  ;;  %s575_s8 = int_to_ptr.vmem [resolvable:$true] %s574_s8 }
  0x31   : > { %716 = vmatmul.msk.f32.vlgmr.msra.gmra.mxu0 %vm284_vm0, %v281_v2  ;;  %s576_s10 = sshll.u32 %s572_s6, 4  ;;  %s561_s15 = scalar_lea.sflag [#allocation4], %s1124_s22  ;;  %s577_s10 = int_to_ptr.hbm [resolvable:$true] %s576_s10 }
  0x32   : > { %s926_s5 = sshra.s32 %s577_s10, 4  ;;  %s932_s28 = scalar_lea.hbm %s1217_s3, 16  ;;  %s927_s5 = int_to_ptr.hbm [resolvable:$true] %s926_s5 }
  0x33   : > { %s928_s9 = scalar_lea.hbm %s927_s5, 8  ;;  %p933_p7 = scmp.lt.s32.totalorder %s927_s5, %s1217_s3 }
  0x34   : > { %p929_p4 = scmp.ne.s32.totalorder %s927_s5, %s928_s9  ;;  %p934_p8 = scmp.lt.s32.totalorder %s932_s28, %s928_s9 }
  0x36   : > { %346 = vrot.lane.b32.xlu1 %v281_v2, %s1000_s29  ;;  %p930_p5 = pnand %p929_p4, %p1078_p9  ;;  %p935_p10 = por %p934_p8, %p933_p7 }
  0x37   : > { %479 = vrot.lane.b32.xlu2 %v282_v0, %s1002_s18 }
  0x38   : > { %p931_p6 = pneg %p930_p5 }
  0x3a   : > { %p936_p13 = pnand %p935_p10, %p931_p6 }
  0x3e   : > { %477 = vrot.lane.b32.xlu1 %v281_v2, %s1002_s18 }
  0x89   : > { %v415_v3 = vpop.permute.xlu2 %414 }
  0x8a   : > { %721 = vmatpush.xpose.msk.msrb.mxu1 %vm284_vm0, %v415_v3 }
  0x91   : > { %v480_v4 = vpop.permute.xlu2 %479 }
  0x92   : > { %724 = vmatpush.xpose.msk.msrb.mxu0 %vm284_vm0, %v480_v4 }
  0xa0   : > { %v349_v5 = vpop.permute.xlu1 %348 }
  0xa1   : > { %718 = vmatpush.xpose.msk.msra.mxu2 %vm284_vm0, %v349_v5 }
  0xa8   : > { %v347_v6 = vpop.permute.xlu1 %346 }
  0xa9   : > { %719 = vmatmul.msk.f32.vlgmr.msra.gmra.mxu2 %vm284_vm0, %v347_v6 }
  0xae   : > { %v308_v7 = vpop.f32.mrf.mxu0 }
  0xaf   : > { %v312_v8 = vsel %vm311_vm1, %v308_v7, -inf }
  0xb0   : > { %313 = vmax.xlane.f32.xlu0 %v312_v8  ;;  %v478_v9 = vpop.permute.xlu1 %477 }
  0xb1   : > { %725 = vmatmul.msk.f32.vlgmr.msrb.gmra.mxu0 %vm284_vm0, %v478_v9 }
 0x123   : > { %v314_v10 = vpop.xlane.xlu0 %313 }
 0x124   : > { %v315_v11 = vsub.f32 %v308_v7, %v314_v10 }
 0x126   : > { %v316_v12 = vmul.f32 1.442695, %v315_v11 }
 0x128   : > { %806 = vpow2.f32 %v316_v12 }
 0x12c   : > { %v371_v13 = vpop.f32.mrf.mxu2 }
 0x12d   : > { %v374_v14 = vsel %vm311_vm1, %v371_v13, -inf }
 0x12e   : > { %v807_v15 = vpop.eup %806  ;;  %375 = vmax.xlane.f32.xlu2 %v374_v14  ;;  %v502_v18 = vpop.f32.mrf.mxu0 }
 0x12f   : > { %v318_v16 = vsel %vm311_vm1, %v807_v15, 0.0  ;;  %v505_v19 = vsel %vm311_vm1, %v502_v18, -inf }
 0x130   : > { %319 = vadd.xlane.f32.xlu0 %v318_v16 }
 0x144   : > { %412 = vrot.lane.b32.xlu0 %v281_v2, %s1001_s4 }
 0x16e   : > { %506 = vmax.xlane.f32.xlu0 %v505_v19 }
 0x182   : > { %451 = vrot.lane.b32.xlu0 %v283_v17, %s1001_s4 }
 0x1a1   : > { %v376_v20 = vpop.xlane.xlu2 %375 }
 0x1a2   : > { %v377_v21 = vsub.f32 %v371_v13, %v376_v20 }
 0x1a3   : > { %v320_v22 = vpop.xlane.xlu0 %319 }
 0x1a4   : > { %808 = vrcp.f32 %v320_v22  ;;  %v378_v23 = vmul.f32 1.442695, %v377_v21 }
 0x1a6   : > { %810 = vpow2.f32 %v378_v23 }
 0x1aa   : > { %v809_v24 = vpop.eup %808 }
 0x1ab   : > { %v322_v25 = vmul.f32 %v809_v24, %v807_v15 }
 0x1ac   : > { %v811_v26 = vpop.eup %810 }
 0x1ad   : > { %717 = vmatmul.msk.f32.vlgmr.msra.gmra.mxu1 %vm311_vm1, %v322_v25  ;;  %v380_v27 = vsel %vm311_vm1, %v811_v26, 0.0 }
 0x1ae   : > { %381 = vadd.xlane.f32.xlu2 %v380_v27 }
 0x1b6   : > { %v413_v28 = vpop.permute.xlu0 %412 }
 0x1b7   : > { %722 = vmatmul.msk.f32.vlgmr.msrb.gmra.mxu1 %vm284_vm0, %v413_v28 }
 0x1e1   : > { %v507_v29 = vpop.xlane.xlu0 %506 }
 0x1e2   : > { %v508_v30 = vsub.f32 %v502_v18, %v507_v29 }
 0x1e4   : > { %v509_v31 = vmul.f32 1.442695, %v508_v30 }
 0x1e6   : > { %812 = vpow2.f32 %v509_v31 }
 0x1ec   : > { %v813_v32 = vpop.eup %812 }
 0x1ed   : > { %v511_v33 = vsel %vm311_vm1, %v813_v32, 0.0 }
 0x1ee   : > { %512 = vadd.xlane.f32.xlu2 %v511_v33 }
 0x1f4   : > { %v452_v46 = vpop.permute.xlu0 %451 }
 0x221   : > { %v382_v41 = vpop.xlane.xlu2 %381 }
 0x22a   : > { %v343_v34 = vpop.f32.mrf.mxu1 }
 0x234   : > { %v437_v35 = vpop.f32.mrf.mxu1 }
 0x235   : > { %v440_v36 = vsel %vm311_vm1, %v437_v35, -inf }
 0x236   : > { %441 = vmax.xlane.f32.xlu1 %v440_v36 }
 0x24f   : > { %386 = vrot.lane.b32.xlu1 %v283_v17, %s1000_s29 }
 0x261   : > { %v513_v47 = vpop.xlane.xlu2 %512 }
 0x2a9   : > { %v442_v37 = vpop.xlane.xlu1 %441 }
 0x2aa   : > { %v443_v38 = vsub.f32 %v437_v35, %v442_v37 }
 0x2ac   : > { %v444_v39 = vmul.f32 1.442695, %v443_v38 }
 0x2ae   : > { %814 = vpow2.f32 %v444_v39 }
 0x2af   : > { %816 = vrcp.f32 %v382_v41 }
 0x2b0   : > { %818 = vrcp.f32 %v513_v47 }
 0x2b4   : > { %v815_v40 = vpop.eup %814 }
 0x2b5   : > { %v446_v42 = vsel %vm311_vm1, %v815_v40, 0.0  ;;  %v817_v43 = vpop.eup %816 }
 0x2b6   : > { %447 = vadd.xlane.f32.xlu2 %v446_v42  ;;  %v384_v45 = vmul.f32 %v817_v43, %v811_v26  ;;  %v819_v49 = vpop.eup %818 }
 0x2b7   : > { %v515_v53 = vmul.f32 %v819_v49, %v813_v32 }
 0x2c1   : > { %v387_v44 = vpop.permute.xlu1 %386 }
 0x2c2   : > { %407 = vmatpush.msra.mxu3 %v387_v44 }
 0x2c3   : > { %720 = vmatmul.msk.f32.vlgmr.msra.gmra.mxu3 %vm311_vm1, %v384_v45 }
 0x2c4   : > { %472 = vmatpush.msrb.mxu3 %v452_v46 }
 0x2ce   : > { %516 = vrot.lane.b32.xlu2 %v283_v17, %s1002_s18 }
 0x329   : > { %v448_v48 = vpop.xlane.xlu2 %447 }
 0x32a   : > { %820 = vrcp.f32 %v448_v48 }
 0x330   : > { %v821_v50 = vpop.eup %820 }
 0x331   : > { %v517_v51 = vpop.permute.xlu2 %516  ;;  %v450_v52 = vmul.f32 %v821_v50, %v815_v40 }
 0x332   : > { %537 = vmatpush.msrb.mxu2 %v517_v51 }
 0x333   : > { %723 = vmatmul.msk.f32.vlgmr.msrb.gmra.mxu3 %vm311_vm1, %v450_v52  ;;  %726 = vmatmul.msk.f32.vlgmr.msrb.gmra.mxu2 %vm311_vm1, %v515_v53 }
 0x346   : > { %v409_v54 = vpop.f32.mrf.mxu3 }
 0x347   : > { %543 = vrot.lane.b32.xlu1 %v409_v54, %s1002_s18 }
 0x3b6   : > { %v474_v55 = vpop.f32.mrf.mxu3  ;;  %v539_v56 = vpop.f32.mrf.mxu2 }
 0x3b7   : > { %551 = vrot.lane.b32.xlu1 %v539_v56, %s1000_s29  ;;  %547 = vrot.lane.b32.xlu0 %v474_v55, %s1001_s4 }
 0x3b9   : > { %v544_v57 = vpop.permute.xlu1 %543 }
 0x3ba   : > { %v554_v58 = vsel %vm284_vm0, %v343_v34, %v544_v57 }
 0x429   : > { %v552_v59 = vpop.permute.xlu1 %551  ;;  %v548_v60 = vpop.permute.xlu0 %547 }
 0x42a   : > { %v556_v61 = vsel %vm555_vm2, %v554_v58, %v548_v60 }
 0x42b   : > { %v558_v62 = vsel %vm557_vm3, %v556_v61, %v552_v59 }
 0x42c   : > { %559 = vst [vmem:[%s279_s7] sm:$0xff] %v558_v62 }
 0x42d   : > { %939 = shalt.err (!%p936_p13)
}
 0x42e   : > { %737 = dma.vmem_to_hbm [thread:$0]  (%p1078_p9), %s575_s8, 128, %s577_s10, %s561_s15  }
 0x42f PF: > { %s588_s22 = sand.u32 1, %s978_s12   ;;  %p750_p0 = pnand %p703_p12, %p1085_p11 }
 0x430   : > { %s589_s20 = scalar_lea.sflag [#allocation4], %s588_s22 }
 0x431   : > { %p751_p1 = pneg %p750_p0 }
 0x433   : > { %973 = dma.done.wait (%p751_p1), %s589_s20, 128  }
 0x434   : > { %975 = vsyncadd (%p751_p1), %s589_s20, 4294967168  ;;  %s22_s17 = sadd.s32 1, %s998_s17   ;;  %s1231_s26 = sld [smem:[#allocation14_spill]] }
 0x435   : > { %p19_p2 = scmp.ge.s32.totalorder %s22_s17, 4   ;;  %s1232_s15 = sld [smem:[#allocation12_spill]] }
 0x436   : > { %s1233_s16 = sld [smem:[#allocation13_spill]]  ;;  %s1234_s12 = smov %s982_s13 }
 0x437   : > { %s1235_s13 = smov %s986_s14  ;;  %21 = sbr.rel (!%p19_p2) target bundleno = 10 (0xa), region = 101 }
 0x43a   : > { %s1236_s14 = smov %s1231_s26 }
 0x43c   :  { %595 = vsyncpa [#allocation3], 1 }
 0x43d   :  { %597 = vsyncpa [#allocation3 + $0x1], 1 }
 0x43e   :  { %598 = vsyncpa [#allocation6], 1 }
 0x43f   :  { %600 = vsyncpa [#allocation6 + $0x1], 1 }
 0x440   :  { %601 = vsyncpa [#allocation4], 1 }
 0x441   :  { %603 = vsyncpa [#allocation4 + $0x1], 1 }

</bundles_post_ra>
